<compile_context>
chip_gen: v6e
topology: v6e:2x2x1
jax: 0.10.0
libtpu: 0.0.40
codegen_flags: <defaults>
</compile_context>

<pallas_src>
import jax
import jax.numpy as jnp
from jax import lax
from jax.experimental import pallas as pl
from jax.experimental.pallas import tpu as pltpu


def _make_conv3x3_relu_kernel(B, Cin, Cout, H, W):
    Wp = W + 2          # padded width (left/right reflect)
    N = H * Wp          # lanes computed per image; 2 garbage cols per row

    def kernel(x_ref, w_ref, b_ref, o_ref):
        # x_ref: (B, Cin, (H+3)*Wp)  reflect-padded input, flattened spatial axis
        # w_ref: (9, Cout, Cin)      per-tap weights, tap index t = dy*3 + dx
        # b_ref: (Cout, 1)           bias (broadcasts over the lane axis)
        # o_ref: (B, Cout, N)        lane-dense output (flat H x Wp, cols W..W+1 garbage)
        bias = b_ref[...]                              # (Cout, 1)
        w_taps = [w_ref[t] for t in range(9)]          # nine (Cout, Cin) tiles, VMEM-resident

        for b in range(B):                             # static; B is tiny
            x = x_ref[b]                               # (Cin, L) single load
            acc = jnp.zeros((Cout, N), jnp.float32)
            for dy in range(3):
                for dx in range(3):
                    off = dy * Wp + dx                 # static python int -> cheap lane rotate
                    tap = x[:, off:off + N]            # (Cin, N) contiguous lane-offset slice
                    acc = acc + jnp.dot(w_taps[dy * 3 + dx], tap,
                                        preferred_element_type=jnp.float32)
            acc = jnp.maximum(acc + bias, 0.0)         # bias + ReLU in f32
            o_ref[b] = acc.astype(o_ref.dtype)

    return kernel


def conv_act(x_nchw, weight_oihw, bias):
    """ConvAct forward: Conv2d(k=3, pad=1, padding_mode='reflect') + ReLU.

    x_nchw:      (B, Cin, H, W)    float32
    weight_oihw: (Cout, Cin, 3, 3) float32  (PyTorch layout)
    bias:        (Cout,)           float32
    returns:     (B, Cout, H, W)   float32
    """
    B, Cin, H, W = x_nchw.shape
    Cout = weight_oihw.shape[0]
    Wp = W + 2
    N = H * Wp
    L = (H + 3) * Wp   # 2 bottom pad rows so the dy=2 tap slices (off up to 2*Wp+2) fit

    # Reflect pad: (1,1) cols, (1,2) rows.  The first bottom row is the real
    # reflection the conv needs; the second only feeds flat positions that the
    # final column slice discards, so its (reflected) contents never matter.
    x_pad = jnp.pad(x_nchw, ((0, 0), (0, 0), (1, 2), (1, 1)), mode="reflect")
    x_flat = x_pad.reshape(B, Cin, L)   # contiguous -> metadata only

    # Pre-pack weights to (tap, Cout, Cin) with tap = dy*3 + dx; bias -> (Cout, 1).
    w_taps = jnp.transpose(weight_oihw, (2, 3, 0, 1)).reshape(9, Cout, Cin)
    b2d = bias.reshape(Cout, 1)

    out_flat = pl.pallas_call(
        _make_conv3x3_relu_kernel(B, Cin, Cout, H, W),
        out_shape=jax.ShapeDtypeStruct((B, Cout, N), x_nchw.dtype),
        grid_spec=pltpu.PrefetchScalarGridSpec(
            num_scalar_prefetch=0,
            grid=(1,),                                   # single step: whole batch at once
            in_specs=[
                pl.BlockSpec((B, Cin, L), lambda i: (0, 0, 0)),
                pl.BlockSpec((9, Cout, Cin), lambda i: (0, 0, 0)),
                pl.BlockSpec((Cout, 1), lambda i: (0, 0)),
            ],
            out_specs=pl.BlockSpec((B, Cout, N), lambda i: (0, 0, 0)),
        ),
        compiler_params=pltpu.CompilerParams(
            dimension_semantics=("arbitrary",),
        ),
    )(x_flat, w_taps, b2d)

    # Metadata reshape + drop the 2 garbage columns per row -> NCHW.
    return out_flat.reshape(B, Cout, H, Wp)[..., :W]


def _reference(x_nchw, weight_oihw, bias):
    """Pure-JAX reference (lax conv) for correctness checking."""
    x_pad = jnp.pad(x_nchw, ((0, 0), (0, 0), (1, 1), (1, 1)), mode="reflect")
    y = lax.conv_general_dilated(
        x_pad, weight_oihw, window_strides=(1, 1), padding="VALID",
        dimension_numbers=("NCHW", "OIHW", "NCHW"),
    )
    return jnp.maximum(y + bias[None, :, None, None], 0.0)


if __name__ == "__main__":
    # Module config: ConvAct(in_planes=4, out_planes=8); input 2x4x16x16.
    B, Cin, Cout, H, W = 2, 4, 8, 16, 16

    key = jax.random.PRNGKey(0)
    kx, kw, kb = jax.random.split(key, 3)

    x = jax.random.normal(kx, (B, Cin, H, W), dtype=jnp.float32)
    fan_in = Cin * 3 * 3
    weight = jax.random.normal(kw, (Cout, Cin, 3, 3), dtype=jnp.float32) / jnp.sqrt(fan_in)
    bias = jax.random.normal(kb, (Cout,), dtype=jnp.float32) * 0.1

    out = jax.block_until_ready(jax.jit(conv_act)(x, weight, bias))

    ref = _reference(x, weight, bias)
    assert out.shape == (B, Cout, H, W)
    assert jnp.allclose(out, ref, atol=1e-4, rtol=1e-4), float(jnp.abs(out - ref).max())

    print("KERNEL_OK")
</pallas_src>

<mosaic_0001>
module attributes {stable_mosaic.version = 11 : i64} {
  func.func @kernel(%arg0: i32, %arg1: memref<2x4x342xf32, #tpu.memory_space<vmem>>, %arg2: memref<9x8x4xf32, #tpu.memory_space<vmem>>, %arg3: memref<8x1xf32, #tpu.memory_space<vmem>>, %arg4: memref<2x8x288xf32, #tpu.memory_space<vmem>>) attributes {dimension_semantics = [#tpu.dimension_semantics<arbitrary>], iteration_bounds = array<i64: 1>, scalar_prefetch = 0 : i64, scratch_operands = 0 : i64, tpu.core_type = #tpu.core_type<tc>, window_params = [{pipeline_mode = #tpu.pipeline_mode<synchronous>, transform_indices = @transform_0, window_bounds = array<i64: 2, 4, 342>}, {pipeline_mode = #tpu.pipeline_mode<synchronous>, transform_indices = @transform_1, window_bounds = array<i64: 9, 8, 4>}, {pipeline_mode = #tpu.pipeline_mode<synchronous>, transform_indices = @transform_2, window_bounds = array<i64: 8, 1>}, {pipeline_mode = #tpu.pipeline_mode<synchronous>, transform_indices = @transform_3, window_bounds = array<i64: 2, 8, 288>}]} {
    %c0 = arith.constant 0 : index
    %c0_0 = arith.constant 0 : index
    %0 = vector.load %arg3[%c0, %c0_0] : memref<8x1xf32, #tpu.memory_space<vmem>>, vector<8x1xf32>
    %c0_1 = arith.constant 0 : index
    %c0_2 = arith.constant 0 : index
    %c0_3 = arith.constant 0 : index
    %1 = vector.load %arg2[%c0_1, %c0_2, %c0_3] : memref<9x8x4xf32, #tpu.memory_space<vmem>>, vector<1x8x4xf32>
    %2 = vector.shape_cast %1 : vector<1x8x4xf32> to vector<8x4xf32>
    %c1 = arith.constant 1 : index
    %c0_4 = arith.constant 0 : index
    %c0_5 = arith.constant 0 : index
    %3 = vector.load %arg2[%c1, %c0_4, %c0_5] : memref<9x8x4xf32, #tpu.memory_space<vmem>>, vector<1x8x4xf32>
    %4 = vector.shape_cast %3 : vector<1x8x4xf32> to vector<8x4xf32>
    %c2 = arith.constant 2 : index
    %c0_6 = arith.constant 0 : index
    %c0_7 = arith.constant 0 : index
    %5 = vector.load %arg2[%c2, %c0_6, %c0_7] : memref<9x8x4xf32, #tpu.memory_space<vmem>>, vector<1x8x4xf32>
    %6 = vector.shape_cast %5 : vector<1x8x4xf32> to vector<8x4xf32>
    %c3 = arith.constant 3 : index
    %c0_8 = arith.constant 0 : index
    %c0_9 = arith.constant 0 : index
    %7 = vector.load %arg2[%c3, %c0_8, %c0_9] : memref<9x8x4xf32, #tpu.memory_space<vmem>>, vector<1x8x4xf32>
    %8 = vector.shape_cast %7 : vector<1x8x4xf32> to vector<8x4xf32>
    %c4 = arith.constant 4 : index
    %c0_10 = arith.constant 0 : index
    %c0_11 = arith.constant 0 : index
    %9 = vector.load %arg2[%c4, %c0_10, %c0_11] : memref<9x8x4xf32, #tpu.memory_space<vmem>>, vector<1x8x4xf32>
    %10 = vector.shape_cast %9 : vector<1x8x4xf32> to vector<8x4xf32>
    %c5 = arith.constant 5 : index
    %c0_12 = arith.constant 0 : index
    %c0_13 = arith.constant 0 : index
    %11 = vector.load %arg2[%c5, %c0_12, %c0_13] : memref<9x8x4xf32, #tpu.memory_space<vmem>>, vector<1x8x4xf32>
    %12 = vector.shape_cast %11 : vector<1x8x4xf32> to vector<8x4xf32>
    %c6 = arith.constant 6 : index
    %c0_14 = arith.constant 0 : index
    %c0_15 = arith.constant 0 : index
    %13 = vector.load %arg2[%c6, %c0_14, %c0_15] : memref<9x8x4xf32, #tpu.memory_space<vmem>>, vector<1x8x4xf32>
    %14 = vector.shape_cast %13 : vector<1x8x4xf32> to vector<8x4xf32>
    %c7 = arith.constant 7 : index
    %c0_16 = arith.constant 0 : index
    %c0_17 = arith.constant 0 : index
    %15 = vector.load %arg2[%c7, %c0_16, %c0_17] : memref<9x8x4xf32, #tpu.memory_space<vmem>>, vector<1x8x4xf32>
    %16 = vector.shape_cast %15 : vector<1x8x4xf32> to vector<8x4xf32>
    %c8 = arith.constant 8 : index
    %c0_18 = arith.constant 0 : index
    %c0_19 = arith.constant 0 : index
    %17 = vector.load %arg2[%c8, %c0_18, %c0_19] : memref<9x8x4xf32, #tpu.memory_space<vmem>>, vector<1x8x4xf32>
    %18 = vector.shape_cast %17 : vector<1x8x4xf32> to vector<8x4xf32>
    %c0_20 = arith.constant 0 : index
    %c0_21 = arith.constant 0 : index
    %c0_22 = arith.constant 0 : index
    %19 = vector.load %arg1[%c0_20, %c0_21, %c0_22] : memref<2x4x342xf32, #tpu.memory_space<vmem>>, vector<1x4x342xf32>
    %20 = vector.shape_cast %19 : vector<1x4x342xf32> to vector<4x342xf32>
    %cst = arith.constant 0.000000e+00 : f32
    %21 = vector.broadcast %cst : f32 to vector<8x288xf32>
    %22 = vector.extract_strided_slice %20 {offsets = [0, 0], sizes = [4, 288], strides = [1, 1]} : vector<4x342xf32> to vector<4x288xf32>
    %cst_23 = arith.constant dense<0.000000e+00> : vector<8x288xf32>
    %23 = tpu.matmul %2, %22, %cst_23 {dimension_numbers = #tpu.dot_dimension_numbers<[1], [0], [0], [1], [0, 0, 1, 1], [], []>} : vector<8x4xf32>, vector<4x288xf32>, vector<8x288xf32> -> vector<8x288xf32>
    %24 = arith.addf %21, %23 : vector<8x288xf32>
    %25 = vector.extract_strided_slice %20 {offsets = [0, 1], sizes = [4, 288], strides = [1, 1]} : vector<4x342xf32> to vector<4x288xf32>
    %cst_24 = arith.constant dense<0.000000e+00> : vector<8x288xf32>
    %26 = tpu.matmul %4, %25, %cst_24 {dimension_numbers = #tpu.dot_dimension_numbers<[1], [0], [0], [1], [0, 0, 1, 1], [], []>} : vector<8x4xf32>, vector<4x288xf32>, vector<8x288xf32> -> vector<8x288xf32>
    %27 = arith.addf %24, %26 : vector<8x288xf32>
    %28 = vector.extract_strided_slice %20 {offsets = [0, 2], sizes = [4, 288], strides = [1, 1]} : vector<4x342xf32> to vector<4x288xf32>
    %cst_25 = arith.constant dense<0.000000e+00> : vector<8x288xf32>
    %29 = tpu.matmul %6, %28, %cst_25 {dimension_numbers = #tpu.dot_dimension_numbers<[1], [0], [0], [1], [0, 0, 1, 1], [], []>} : vector<8x4xf32>, vector<4x288xf32>, vector<8x288xf32> -> vector<8x288xf32>
    %30 = arith.addf %27, %29 : vector<8x288xf32>
    %31 = vector.extract_strided_slice %20 {offsets = [0, 18], sizes = [4, 288], strides = [1, 1]} : vector<4x342xf32> to vector<4x288xf32>
    %cst_26 = arith.constant dense<0.000000e+00> : vector<8x288xf32>
    %32 = tpu.matmul %8, %31, %cst_26 {dimension_numbers = #tpu.dot_dimension_numbers<[1], [0], [0], [1], [0, 0, 1, 1], [], []>} : vector<8x4xf32>, vector<4x288xf32>, vector<8x288xf32> -> vector<8x288xf32>
    %33 = arith.addf %30, %32 : vector<8x288xf32>
    %34 = vector.extract_strided_slice %20 {offsets = [0, 19], sizes = [4, 288], strides = [1, 1]} : vector<4x342xf32> to vector<4x288xf32>
    %cst_27 = arith.constant dense<0.000000e+00> : vector<8x288xf32>
    %35 = tpu.matmul %10, %34, %cst_27 {dimension_numbers = #tpu.dot_dimension_numbers<[1], [0], [0], [1], [0, 0, 1, 1], [], []>} : vector<8x4xf32>, vector<4x288xf32>, vector<8x288xf32> -> vector<8x288xf32>
    %36 = arith.addf %33, %35 : vector<8x288xf32>
    %37 = vector.extract_strided_slice %20 {offsets = [0, 20], sizes = [4, 288], strides = [1, 1]} : vector<4x342xf32> to vector<4x288xf32>
    %cst_28 = arith.constant dense<0.000000e+00> : vector<8x288xf32>
    %38 = tpu.matmul %12, %37, %cst_28 {dimension_numbers = #tpu.dot_dimension_numbers<[1], [0], [0], [1], [0, 0, 1, 1], [], []>} : vector<8x4xf32>, vector<4x288xf32>, vector<8x288xf32> -> vector<8x288xf32>
    %39 = arith.addf %36, %38 : vector<8x288xf32>
    %40 = vector.extract_strided_slice %20 {offsets = [0, 36], sizes = [4, 288], strides = [1, 1]} : vector<4x342xf32> to vector<4x288xf32>
    %cst_29 = arith.constant dense<0.000000e+00> : vector<8x288xf32>
    %41 = tpu.matmul %14, %40, %cst_29 {dimension_numbers = #tpu.dot_dimension_numbers<[1], [0], [0], [1], [0, 0, 1, 1], [], []>} : vector<8x4xf32>, vector<4x288xf32>, vector<8x288xf32> -> vector<8x288xf32>
    %42 = arith.addf %39, %41 : vector<8x288xf32>
    %43 = vector.extract_strided_slice %20 {offsets = [0, 37], sizes = [4, 288], strides = [1, 1]} : vector<4x342xf32> to vector<4x288xf32>
    %cst_30 = arith.constant dense<0.000000e+00> : vector<8x288xf32>
    %44 = tpu.matmul %16, %43, %cst_30 {dimension_numbers = #tpu.dot_dimension_numbers<[1], [0], [0], [1], [0, 0, 1, 1], [], []>} : vector<8x4xf32>, vector<4x288xf32>, vector<8x288xf32> -> vector<8x288xf32>
    %45 = arith.addf %42, %44 : vector<8x288xf32>
    %46 = vector.extract_strided_slice %20 {offsets = [0, 38], sizes = [4, 288], strides = [1, 1]} : vector<4x342xf32> to vector<4x288xf32>
    %cst_31 = arith.constant dense<0.000000e+00> : vector<8x288xf32>
    %47 = tpu.matmul %18, %46, %cst_31 {dimension_numbers = #tpu.dot_dimension_numbers<[1], [0], [0], [1], [0, 0, 1, 1], [], []>} : vector<8x4xf32>, vector<4x288xf32>, vector<8x288xf32> -> vector<8x288xf32>
    %48 = arith.addf %45, %47 : vector<8x288xf32>
    %49 = vector.broadcast %0 : vector<8x1xf32> to vector<8x288xf32>
    %50 = arith.addf %48, %49 : vector<8x288xf32>
    %cst_32 = arith.constant 0.000000e+00 : f32
    %51 = vector.broadcast %cst_32 : f32 to vector<8x288xf32>
    %52 = arith.maximumf %50, %51 : vector<8x288xf32>
    %c0_33 = arith.constant 0 : index
    %c0_34 = arith.constant 0 : index
    %c0_35 = arith.constant 0 : index
    %53 = vector.load %arg4[%c0_33, %c0_34, %c0_35] : memref<2x8x288xf32, #tpu.memory_space<vmem>>, vector<1x8x288xf32>
    %54 = vector.shape_cast %53 : vector<1x8x288xf32> to vector<8x288xf32>
    %55 = vector.shape_cast %52 : vector<8x288xf32> to vector<1x8x288xf32>
    tpu.vector_store %arg4[%c0_33, %c0_34, %c0_35], %55 {strides = array<i32>} : memref<2x8x288xf32, #tpu.memory_space<vmem>>, vector<1x8x288xf32>,
    %c1_36 = arith.constant 1 : index
    %c0_37 = arith.constant 0 : index
    %c0_38 = arith.constant 0 : index
    %56 = vector.load %arg1[%c1_36, %c0_37, %c0_38] : memref<2x4x342xf32, #tpu.memory_space<vmem>>, vector<1x4x342xf32>
    %57 = vector.shape_cast %56 : vector<1x4x342xf32> to vector<4x342xf32>
    %cst_39 = arith.constant 0.000000e+00 : f32
    %58 = vector.broadcast %cst_39 : f32 to vector<8x288xf32>
    %59 = vector.extract_strided_slice %57 {offsets = [0, 0], sizes = [4, 288], strides = [1, 1]} : vector<4x342xf32> to vector<4x288xf32>
    %cst_40 = arith.constant dense<0.000000e+00> : vector<8x288xf32>
    %60 = tpu.matmul %2, %59, %cst_40 {dimension_numbers = #tpu.dot_dimension_numbers<[1], [0], [0], [1], [0, 0, 1, 1], [], []>} : vector<8x4xf32>, vector<4x288xf32>, vector<8x288xf32> -> vector<8x288xf32>
    %61 = arith.addf %58, %60 : vector<8x288xf32>
    %62 = vector.extract_strided_slice %57 {offsets = [0, 1], sizes = [4, 288], strides = [1, 1]} : vector<4x342xf32> to vector<4x288xf32>
    %cst_41 = arith.constant dense<0.000000e+00> : vector<8x288xf32>
    %63 = tpu.matmul %4, %62, %cst_41 {dimension_numbers = #tpu.dot_dimension_numbers<[1], [0], [0], [1], [0, 0, 1, 1], [], []>} : vector<8x4xf32>, vector<4x288xf32>, vector<8x288xf32> -> vector<8x288xf32>
    %64 = arith.addf %61, %63 : vector<8x288xf32>
    %65 = vector.extract_strided_slice %57 {offsets = [0, 2], sizes = [4, 288], strides = [1, 1]} : vector<4x342xf32> to vector<4x288xf32>
    %cst_42 = arith.constant dense<0.000000e+00> : vector<8x288xf32>
    %66 = tpu.matmul %6, %65, %cst_42 {dimension_numbers = #tpu.dot_dimension_numbers<[1], [0], [0], [1], [0, 0, 1, 1], [], []>} : vector<8x4xf32>, vector<4x288xf32>, vector<8x288xf32> -> vector<8x288xf32>
    %67 = arith.addf %64, %66 : vector<8x288xf32>
    %68 = vector.extract_strided_slice %57 {offsets = [0, 18], sizes = [4, 288], strides = [1, 1]} : vector<4x342xf32> to vector<4x288xf32>
    %cst_43 = arith.constant dense<0.000000e+00> : vector<8x288xf32>
    %69 = tpu.matmul %8, %68, %cst_43 {dimension_numbers = #tpu.dot_dimension_numbers<[1], [0], [0], [1], [0, 0, 1, 1], [], []>} : vector<8x4xf32>, vector<4x288xf32>, vector<8x288xf32> -> vector<8x288xf32>
    %70 = arith.addf %67, %69 : vector<8x288xf32>
    %71 = vector.extract_strided_slice %57 {offsets = [0, 19], sizes = [4, 288], strides = [1, 1]} : vector<4x342xf32> to vector<4x288xf32>
    %cst_44 = arith.constant dense<0.000000e+00> : vector<8x288xf32>
    %72 = tpu.matmul %10, %71, %cst_44 {dimension_numbers = #tpu.dot_dimension_numbers<[1], [0], [0], [1], [0, 0, 1, 1], [], []>} : vector<8x4xf32>, vector<4x288xf32>, vector<8x288xf32> -> vector<8x288xf32>
    %73 = arith.addf %70, %72 : vector<8x288xf32>
    %74 = vector.extract_strided_slice %57 {offsets = [0, 20], sizes = [4, 288], strides = [1, 1]} : vector<4x342xf32> to vector<4x288xf32>
    %cst_45 = arith.constant dense<0.000000e+00> : vector<8x288xf32>
    %75 = tpu.matmul %12, %74, %cst_45 {dimension_numbers = #tpu.dot_dimension_numbers<[1], [0], [0], [1], [0, 0, 1, 1], [], []>} : vector<8x4xf32>, vector<4x288xf32>, vector<8x288xf32> -> vector<8x288xf32>
    %76 = arith.addf %73, %75 : vector<8x288xf32>
    %77 = vector.extract_strided_slice %57 {offsets = [0, 36], sizes = [4, 288], strides = [1, 1]} : vector<4x342xf32> to vector<4x288xf32>
    %cst_46 = arith.constant dense<0.000000e+00> : vector<8x288xf32>
    %78 = tpu.matmul %14, %77, %cst_46 {dimension_numbers = #tpu.dot_dimension_numbers<[1], [0], [0], [1], [0, 0, 1, 1], [], []>} : vector<8x4xf32>, vector<4x288xf32>, vector<8x288xf32> -> vector<8x288xf32>
    %79 = arith.addf %76, %78 : vector<8x288xf32>
    %80 = vector.extract_strided_slice %57 {offsets = [0, 37], sizes = [4, 288], strides = [1, 1]} : vector<4x342xf32> to vector<4x288xf32>
    %cst_47 = arith.constant dense<0.000000e+00> : vector<8x288xf32>
    %81 = tpu.matmul %16, %80, %cst_47 {dimension_numbers = #tpu.dot_dimension_numbers<[1], [0], [0], [1], [0, 0, 1, 1], [], []>} : vector<8x4xf32>, vector<4x288xf32>, vector<8x288xf32> -> vector<8x288xf32>
    %82 = arith.addf %79, %81 : vector<8x288xf32>
    %83 = vector.extract_strided_slice %57 {offsets = [0, 38], sizes = [4, 288], strides = [1, 1]} : vector<4x342xf32> to vector<4x288xf32>
    %cst_48 = arith.constant dense<0.000000e+00> : vector<8x288xf32>
    %84 = tpu.matmul %18, %83, %cst_48 {dimension_numbers = #tpu.dot_dimension_numbers<[1], [0], [0], [1], [0, 0, 1, 1], [], []>} : vector<8x4xf32>, vector<4x288xf32>, vector<8x288xf32> -> vector<8x288xf32>
    %85 = arith.addf %82, %84 : vector<8x288xf32>
    %86 = vector.broadcast %0 : vector<8x1xf32> to vector<8x288xf32>
    %87 = arith.addf %85, %86 : vector<8x288xf32>
    %cst_49 = arith.constant 0.000000e+00 : f32
    %88 = vector.broadcast %cst_49 : f32 to vector<8x288xf32>
    %89 = arith.maximumf %87, %88 : vector<8x288xf32>
    %c1_50 = arith.constant 1 : index
    %c0_51 = arith.constant 0 : index
    %c0_52 = arith.constant 0 : index
    %90 = vector.load %arg4[%c1_50, %c0_51, %c0_52] : memref<2x8x288xf32, #tpu.memory_space<vmem>>, vector<1x8x288xf32>
    %91 = vector.shape_cast %90 : vector<1x8x288xf32> to vector<8x288xf32>
    %92 = vector.shape_cast %89 : vector<8x288xf32> to vector<1x8x288xf32>
    tpu.vector_store %arg4[%c1_50, %c0_51, %c0_52], %92 {strides = array<i32>} : memref<2x8x288xf32, #tpu.memory_space<vmem>>, vector<1x8x288xf32>,
    return
  }
  func.func @transform_0(%arg0: i32) -> (i32, i32, i32) {
    %c0_i32 = arith.constant 0 : i32
    %c0_i32_0 = arith.constant 0 : i32
    %c0_i32_1 = arith.constant 0 : i32
    %c0_i32_2 = arith.constant 0 : i32
    return %c0_i32, %c0_i32_0, %c0_i32_1 : i32, i32, i32
  }
  func.func @transform_1(%arg0: i32) -> (i32, i32, i32) {
    %c0_i32 = arith.constant 0 : i32
    %c0_i32_0 = arith.constant 0 : i32
    %c0_i32_1 = arith.constant 0 : i32
    %c0_i32_2 = arith.constant 0 : i32
    return %c0_i32, %c0_i32_0, %c0_i32_1 : i32, i32, i32
  }
  func.func @transform_2(%arg0: i32) -> (i32, i32) {
    %c0_i32 = arith.constant 0 : i32
    %c0_i32_0 = arith.constant 0 : i32
    %c0_i32_1 = arith.constant 0 : i32
    return %c0_i32, %c0_i32_0 : i32, i32
  }
  func.func @transform_3(%arg0: i32) -> (i32, i32, i32) {
    %c0_i32 = arith.constant 0 : i32
    %c0_i32_0 = arith.constant 0 : i32
    %c0_i32_1 = arith.constant 0 : i32
    %c0_i32_2 = arith.constant 0 : i32
    return %c0_i32, %c0_i32_0, %c0_i32_1 : i32, i32, i32
  }
}

</mosaic_0001>

<bundles_post_ra>
// kernel: conv_act.1
= control target key start
LH: loop header
LB: loop body
LE: loop exit
PB: predicated region body
PF: predicated region fallthrough
CT: control target
= control target key end

     0   :  { %v3168_v2 = vmov 0.0   ;;  %vm3169_vm0 = vmmov 0   ;;  %s3170_s16 = smov 127   ;;  %s3171_s17 = smov 126   ;;  %v3178_v7 = vmov 0   ;;  %vm50_vm1 = vcmask 1043456   ;;  %s3635_s0 = inlined_call_operand.vmem [shape: f32[2,4,342], index: 0, kind: input, shape index: {}]   ;;  %s3636_s2 = inlined_call_operand.vmem [shape: f32[8,1], index: 2, kind: input, shape index: {}]   ;;  %s3637_s1 = inlined_call_operand.vmem [shape: f32[9,8,4], index: 1, kind: input, shape index: {}]   ;;  %s3638_s3 = inlined_call_operand.vmem [shape: f32[2,8,288], index: 3, kind: output, shape index: {}]  }
   0x1   :  { %v3202_v0 = vld [vmem:[%s3635_s0 + $0x8] sm:$0xf]  ;;  %v3207_v1 = vld [vmem:[%s3635_s0] sm:$0xff]  ;;  %3064 = vmatprep.subr.mxu1 %v3168_v2  ;;  %3066 = vmatprep.mubr.msk.f32.mxu1 %vm3169_vm0, %v3168_v2  ;;  %s3172_s18 = smov 110   ;;  %s3173_s19 = smov 109   ;;  %v3264_v4 = vld [vmem:[%s3635_s0 + $0xc] sm:$0xff] }
   0x2   :  { %41 = vrot.lane.b32.xlu0 %v3202_v0, %s3170_s16  ;;  %37 = vrot.lane.b32.xlu1 %v3207_v1, %s3170_s16  ;;  %v3218_v3 = vcombine.high %v3207_v1, %v3207_v1  ;;  %s3174_s20 = smov 108   ;;  %s3175_s21 = smov 92   ;;  %v3272_v5 = vcombine.high %v3264_v4, %v3264_v4  ;;  %v3277_v6 = vld [vmem:[%s3635_s0 + $0x14] sm:$0xf]  ;;  %v14_v8 = vld [vmem:[%s3636_s2] sm:$0xff]  ;;  %vm46_vm2 = vcmask 31744  }
   0x3   :  { %121 = vmatprep.mubr.f32.mxu0 %v3168_v2  ;;  %s3176_s22 = smov 91   ;;  %s3177_s23 = smov 90   ;;  %3165 = vset.pattern.permute.xlu0 %v3178_v7  ;;  %v3333_v9 = vld [vmem:[%s3637_s1 + $0x8] sm:$0xff]  ;;  %vm43_vm3 = vcmask 1039360   ;;  %v3346_v12 = vld [vmem:[%s3637_s1] sm:$0xff]  ;;  %vm354_vm4 = vcmask 1031168  }
   0x4   :  { %v3364_v19 = vld [vmem:[%s3637_s1 + $0x10] sm:$0xff]  ;;  %vm516_vm5 = vcmask 900096   ;;  %v3383_v24 = vld [vmem:[%s3637_s1 + $0x18] sm:$0xff]  ;;  %vm678_vm6 = vcmask 891904   ;;  %v3405_v31 = vld [vmem:[%s3637_s1 + $0x20] sm:$0xff]  ;;  %vm840_vm7 = vcmask 883712  }
   0x5   :  { %v3423_v36 = vld [vmem:[%s3637_s1 + $0x28] sm:$0xff]  ;;  %vm1002_vm8 = vcmask 752640   ;;  %v3445_v45 = vld [vmem:[%s3637_s1 + $0x30] sm:$0xff]  ;;  %vm1164_vm9 = vcmask 744448   ;;  %v3459_v48 = vld [vmem:[%s3637_s1 + $0x38] sm:$0xff]  ;;  %vm1326_vm10 = vcmask 736256  }
   0x6   :  { %350 = vrot.lane.b32.xlu1 %v3218_v3, %s3171_s17  ;;  %39 = vrot.lane.b32.xlu0 %v3218_v3, %s3170_s16  ;;  %v3477_v53 = vld [vmem:[%s3637_s1 + $0x40] sm:$0xff]  ;;  %vm1495_vm11 = vcmask 261120  }
   0xa   :  { %348 = vrot.lane.b32.xlu1 %v3207_v1, %s3171_s17  ;;  %352 = vrot.lane.b32.xlu0 %v3202_v0, %s3171_s17 }
   0xe   :  { %514 = vrot.lane.b32.xlu1 %v3202_v0, %s3172_s18  ;;  %512 = vrot.lane.b32.xlu0 %v3218_v3, %s3172_s18 }
  0x12   :  { %674 = vrot.lane.b32.xlu1 %v3218_v3, %s3173_s19  ;;  %510 = vrot.lane.b32.xlu0 %v3207_v1, %s3172_s18 }
  0x16   :  { %672 = vrot.lane.b32.xlu1 %v3207_v1, %s3173_s19  ;;  %676 = vrot.lane.b32.xlu0 %v3202_v0, %s3173_s19 }
  0x1a   :  { %838 = vrot.lane.b32.xlu1 %v3202_v0, %s3174_s20  ;;  %836 = vrot.lane.b32.xlu0 %v3218_v3, %s3174_s20 }
  0x1e   :  { %998 = vrot.lane.b32.xlu1 %v3218_v3, %s3175_s21  ;;  %834 = vrot.lane.b32.xlu0 %v3207_v1, %s3174_s20 }
  0x22   :  { %996 = vrot.lane.b32.xlu1 %v3207_v1, %s3175_s21  ;;  %1000 = vrot.lane.b32.xlu0 %v3202_v0, %s3175_s21 }
  0x26   :  { %1162 = vrot.lane.b32.xlu1 %v3202_v0, %s3176_s22  ;;  %1160 = vrot.lane.b32.xlu0 %v3218_v3, %s3176_s22 }
  0x2a   :  { %1322 = vrot.lane.b32.xlu1 %v3218_v3, %s3177_s23  ;;  %1158 = vrot.lane.b32.xlu0 %v3207_v1, %s3176_s22 }
  0x2e   :  { %1320 = vrot.lane.b32.xlu1 %v3207_v1, %s3177_s23  ;;  %1324 = vrot.lane.b32.xlu0 %v3202_v0, %s3177_s23 }
  0x32   :  { %1507 = vrot.lane.b32.xlu1 %v3277_v6, %s3170_s16  ;;  %1505 = vrot.lane.b32.xlu0 %v3272_v5, %s3170_s16 }
  0x36   :  { %1807 = vrot.lane.b32.xlu1 %v3272_v5, %s3171_s17  ;;  %1503 = vrot.lane.b32.xlu0 %v3264_v4, %s3170_s16 }
  0x3a   :  { %1805 = vrot.lane.b32.xlu1 %v3264_v4, %s3171_s17  ;;  %1809 = vrot.lane.b32.xlu0 %v3277_v6, %s3171_s17 }
  0x3e   :  { %1967 = vrot.lane.b32.xlu1 %v3277_v6, %s3172_s18  ;;  %1965 = vrot.lane.b32.xlu0 %v3272_v5, %s3172_s18 }
  0x42   :  { %2123 = vrot.lane.b32.xlu1 %v3272_v5, %s3173_s19  ;;  %1963 = vrot.lane.b32.xlu0 %v3264_v4, %s3172_s18 }
  0x46   :  { %2121 = vrot.lane.b32.xlu1 %v3264_v4, %s3173_s19  ;;  %2125 = vrot.lane.b32.xlu0 %v3277_v6, %s3173_s19 }
  0x4a   :  { %2283 = vrot.lane.b32.xlu1 %v3277_v6, %s3174_s20  ;;  %2281 = vrot.lane.b32.xlu0 %v3272_v5, %s3174_s20 }
  0x4e   :  { %2439 = vrot.lane.b32.xlu1 %v3272_v5, %s3175_s21  ;;  %2279 = vrot.lane.b32.xlu0 %v3264_v4, %s3174_s20 }
  0x52   :  { %2437 = vrot.lane.b32.xlu1 %v3264_v4, %s3175_s21  ;;  %2441 = vrot.lane.b32.xlu0 %v3277_v6, %s3175_s21 }
  0x56   :  { %2599 = vrot.lane.b32.xlu1 %v3277_v6, %s3176_s22  ;;  %2597 = vrot.lane.b32.xlu0 %v3272_v5, %s3176_s22 }
  0x5a   :  { %2755 = vrot.lane.b32.xlu1 %v3272_v5, %s3177_s23  ;;  %2595 = vrot.lane.b32.xlu0 %v3264_v4, %s3176_s22 }
  0x5e   :  { %2753 = vrot.lane.b32.xlu1 %v3264_v4, %s3177_s23  ;;  %2757 = vrot.lane.b32.xlu0 %v3277_v6, %s3177_s23 }
  0x62   :  { %1484 = vperm.xlu0 %3165, %v14_v8  }
  0x74   :  { %v42_v10 = vpop.permute.xlu0 %41  ;;  %v38_v11 = vpop.permute.xlu1 %37 }
  0x75   :  { %3065 = vmatpush3.msk.msra.mxu1 %vm50_vm1, %v42_v10 }
  0x76   :  { %3067 = vmatmul.mubr.msk.f32.vlgmr.msra.gmra.mxu1 %vm46_vm2, %v3333_v9  ;;  %3069 = vmatprep.subr.mxu1 %v3168_v2 }
  0x77   :  { %3070 = vmatpush3.msk.msra.mxu1 %vm50_vm1, %v3202_v0  ;;  %3071 = vmatprep.mubr.msk.f32.mxu1 %vm3169_vm0, %v3168_v2 }
  0x78   :  { %v351_v13 = vpop.permute.xlu1 %350  ;;  %v40_v14 = vpop.permute.xlu0 %39  ;;  %3074 = vmatprep.subr.mxu1 %v3168_v2 }
  0x79   :  { %v45_v15 = vsel %vm43_vm3, %v40_v14, %v42_v10  ;;  %v44_v16 = vsel %vm43_vm3, %v38_v11, %v40_v14 }
  0x7a   :  { %2933 = vmatprep.subr.msk.mxu0 %vm50_vm1, %v45_v15  ;;  %3072 = vmatmul.mubr.msk.f32.vlgmr.msra.gmra.mxu1 %vm46_vm2, %v3346_v12 }
  0x7b   :  { %2934 = vmatpush1.msk.msra.mxu0 %vm50_vm1, %v44_v16  ;;  %3076 = vmatprep.mubr.msk.f32.mxu1 %vm3169_vm0, %v3168_v2 }
  0x7c   :  { %v349_v17 = vpop.permute.xlu1 %348  ;;  %2935 = vmatmul.mubr.msk.f32.vlgmr.msra.gmra.mxu0 %vm46_vm2, %v3333_v9  ;;  %2938 = vmatprep.subr.msk.mxu0 %vm50_vm1, %v3218_v3  ;;  %v353_v18 = vpop.permute.xlu0 %352 }
  0x7d   :  { %v356_v20 = vsel %vm354_vm4, %v351_v13, %v353_v18  ;;  %2939 = vmatpush1.msk.msra.mxu0 %vm50_vm1, %v3207_v1  ;;  %3075 = vmatpush3.msk.msra.mxu1 %vm50_vm1, %v353_v18  ;;  %v355_v21 = vsel %vm354_vm4, %v349_v17, %v351_v13 }
  0x7e   :  { %2943 = vmatprep.subr.msk.mxu0 %vm50_vm1, %v356_v20  ;;  %271 = vmatprep.mubr.f32.mxu0 %v3168_v2 }
  0x7f   :  { %3079 = vmatprep.subr.mxu1 %v3168_v2  ;;  %3077 = vmatmul.mubr.msk.f32.vlgmr.msra.gmra.mxu1 %vm46_vm2, %v3364_v19 }
  0x80   :  { %v515_v22 = vpop.permute.xlu1 %514  ;;  %2940 = vmatmul.mubr.msk.f32.vlgmr.msra.gmra.mxu0 %vm46_vm2, %v3346_v12  ;;  %v513_v23 = vpop.permute.xlu0 %512  ;;  %3081 = vmatprep.mubr.msk.f32.mxu1 %vm3169_vm0, %v3168_v2 }
  0x81   :  { %2944 = vmatpush1.msk.msra.mxu0 %vm50_vm1, %v355_v21  ;;  %v518_v25 = vsel %vm516_vm5, %v513_v23, %v515_v22  ;;  %3080 = vmatpush3.msk.msra.mxu1 %vm50_vm1, %v515_v22 }
  0x82   :  { %2948 = vmatprep.subr.msk.mxu0 %vm50_vm1, %v518_v25  ;;  %430 = vmatprep.mubr.f32.mxu0 %v3168_v2 }
  0x83   :  { %3084 = vmatprep.subr.mxu1 %v3168_v2  ;;  %3082 = vmatmul.mubr.msk.f32.vlgmr.msra.gmra.mxu1 %vm46_vm2, %v3383_v24 }
  0x84   :  { %v675_v26 = vpop.permute.xlu1 %674  ;;  %v511_v27 = vpop.permute.xlu0 %510  ;;  %2945 = vmatmul.mubr.msk.f32.vlgmr.msra.gmra.mxu0 %vm46_vm2, %v3364_v19  ;;  %3086 = vmatprep.mubr.msk.f32.mxu1 %vm3169_vm0, %v3168_v2 }
  0x85   :  { %v517_v28 = vsel %vm516_vm5, %v511_v27, %v513_v23  ;;  %592 = vmatprep.mubr.f32.mxu0 %v3168_v2 }
  0x86   :  { %2949 = vmatpush1.msk.msra.mxu0 %vm50_vm1, %v517_v28 }
  0x88   :  { %v673_v29 = vpop.permute.xlu1 %672  ;;  %v677_v30 = vpop.permute.xlu0 %676  ;;  %2950 = vmatmul.mubr.msk.f32.vlgmr.msra.gmra.mxu0 %vm46_vm2, %v3383_v24 }
  0x89   :  { %v679_v32 = vsel %vm678_vm6, %v673_v29, %v675_v26  ;;  %v680_v33 = vsel %vm678_vm6, %v675_v26, %v677_v30  ;;  %3085 = vmatpush3.msk.msra.mxu1 %vm50_vm1, %v677_v30  ;;  %754 = vmatprep.mubr.f32.mxu0 %v3168_v2 }
  0x8a   :  { %2953 = vmatprep.subr.msk.mxu0 %vm50_vm1, %v680_v33  ;;  %3089 = vmatprep.subr.mxu1 %v3168_v2 }
  0x8b   :  { %2954 = vmatpush1.msk.msra.mxu0 %vm50_vm1, %v679_v32  ;;  %3087 = vmatmul.mubr.msk.f32.vlgmr.msra.gmra.mxu1 %vm46_vm2, %v3405_v31 }
  0x8c   :  { %v839_v34 = vpop.permute.xlu1 %838  ;;  %v837_v35 = vpop.permute.xlu0 %836  ;;  %2955 = vmatmul.mubr.msk.f32.vlgmr.msra.gmra.mxu0 %vm46_vm2, %v3405_v31  ;;  %3091 = vmatprep.mubr.msk.f32.mxu1 %vm3169_vm0, %v3168_v2 }
  0x8d   :  { %v842_v37 = vsel %vm840_vm7, %v837_v35, %v839_v34  ;;  %3090 = vmatpush3.msk.msra.mxu1 %vm50_vm1, %v839_v34  ;;  %916 = vmatprep.mubr.f32.mxu0 %v3168_v2 }
  0x8e   :  { %2958 = vmatprep.subr.msk.mxu0 %vm50_vm1, %v842_v37  ;;  %3094 = vmatprep.subr.mxu1 %v3168_v2 }
  0x8f   :  { %3092 = vmatmul.mubr.msk.f32.vlgmr.msra.gmra.mxu1 %vm46_vm2, %v3423_v36 }
  0x90   :  { %v999_v38 = vpop.permute.xlu1 %998  ;;  %v835_v39 = vpop.permute.xlu0 %834  ;;  %3096 = vmatprep.mubr.msk.f32.mxu1 %vm3169_vm0, %v3168_v2 }
  0x91   :  { %v841_v40 = vsel %vm840_vm7, %v835_v39, %v837_v35 }
  0x92   :  { %2959 = vmatpush1.msk.msra.mxu0 %vm50_vm1, %v841_v40 }
  0x93   :  { %2960 = vmatmul.mubr.msk.f32.vlgmr.msra.gmra.mxu0 %vm46_vm2, %v3423_v36 }
  0x94   :  { %v997_v41 = vpop.permute.xlu1 %996  ;;  %v1001_v42 = vpop.permute.xlu0 %1000  ;;  %1078 = vmatprep.mubr.f32.mxu0 %v3168_v2 }
  0x95   :  { %v1003_v43 = vsel %vm1002_vm8, %v997_v41, %v999_v38  ;;  %v1004_v44 = vsel %vm1002_vm8, %v999_v38, %v1001_v42  ;;  %3095 = vmatpush3.msk.msra.mxu1 %vm50_vm1, %v1001_v42 }
  0x96   :  { %2963 = vmatprep.subr.msk.mxu0 %vm50_vm1, %v1004_v44  ;;  %3099 = vmatprep.subr.mxu1 %v3168_v2 }
  0x97   :  { %2964 = vmatpush1.msk.msra.mxu0 %vm50_vm1, %v1003_v43  ;;  %3097 = vmatmul.mubr.msk.f32.vlgmr.msra.gmra.mxu1 %vm46_vm2, %v3445_v45 }
  0x98   :  { %v1163_v46 = vpop.permute.xlu1 %1162  ;;  %v1161_v47 = vpop.permute.xlu0 %1160  ;;  %2965 = vmatmul.mubr.msk.f32.vlgmr.msra.gmra.mxu0 %vm46_vm2, %v3445_v45  ;;  %3101 = vmatprep.mubr.msk.f32.mxu1 %vm3169_vm0, %v3168_v2 }
  0x99   :  { %v1166_v49 = vsel %vm1164_vm9, %v1161_v47, %v1163_v46  ;;  %3100 = vmatpush3.msk.msra.mxu1 %vm50_vm1, %v1163_v46  ;;  %1240 = vmatprep.mubr.f32.mxu0 %v3168_v2 }
  0x9a   :  { %2968 = vmatprep.subr.msk.mxu0 %vm50_vm1, %v1166_v49  ;;  %3104 = vmatprep.subr.mxu1 %v3168_v2 }
  0x9b   :  { %3102 = vmatmul.mubr.msk.f32.vlgmr.msra.gmra.mxu1 %vm46_vm2, %v3459_v48 }
  0x9c   :  { %v1323_v50 = vpop.permute.xlu1 %1322  ;;  %v1159_v51 = vpop.permute.xlu0 %1158  ;;  %3106 = vmatprep.mubr.msk.f32.mxu1 %vm3169_vm0, %v3168_v2 }
  0x9d   :  { %v1165_v52 = vsel %vm1164_vm9, %v1159_v51, %v1161_v47 }
  0x9e   :  { %2969 = vmatpush1.msk.msra.mxu0 %vm50_vm1, %v1165_v52 }
  0x9f   :  { %2970 = vmatmul.mubr.msk.f32.vlgmr.msra.gmra.mxu0 %vm46_vm2, %v3459_v48 }
  0xa0   :  { %v1321_v54 = vpop.permute.xlu1 %1320  ;;  %v1325_v55 = vpop.permute.xlu0 %1324  ;;  %1402 = vmatprep.mubr.f32.mxu0 %v3168_v2 }
  0xa1   :  { %v1327_v56 = vsel %vm1326_vm10, %v1321_v54, %v1323_v50  ;;  %v1328_v57 = vsel %vm1326_vm10, %v1323_v50, %v1325_v55  ;;  %3105 = vmatpush3.msk.msra.mxu1 %vm50_vm1, %v1325_v55 }
  0xa2   :  { %2973 = vmatprep.subr.msk.mxu0 %vm50_vm1, %v1328_v57  ;;  %3107 = vmatmul.mubr.msk.f32.vlgmr.msra.gmra.mxu1 %vm46_vm2, %v3477_v53 }
  0xa3   :  { %2974 = vmatpush1.msk.msra.mxu0 %vm50_vm1, %v1327_v56  ;;  %3109 = vmatprep.subr.mxu1 %v3168_v2 }
  0xa4   :  { %v1508_v58 = vpop.permute.xlu1 %1507  ;;  %2975 = vmatmul.mubr.msk.f32.vlgmr.msra.gmra.mxu0 %vm46_vm2, %v3477_v53  ;;  %v1506_v59 = vpop.permute.xlu0 %1505  ;;  %3111 = vmatprep.mubr.msk.f32.mxu1 %vm3169_vm0, %v3168_v2 }
  0xa5   :  { %v1510_v60 = vsel %vm43_vm3, %v1506_v59, %v1508_v58  ;;  %3110 = vmatpush3.msk.msra.mxu1 %vm50_vm1, %v1508_v58  ;;  %1581 = vmatprep.mubr.f32.mxu0 %v3168_v2 }
  0xa6   :  { %2980 = vmatprep.subr.msk.mxu0 %vm50_vm1, %v1510_v60  ;;  %3112 = vmatmul.mubr.msk.f32.vlgmr.msra.gmra.mxu1 %vm46_vm2, %v3333_v9 }
  0xa7   :  { %3114 = vmatprep.subr.mxu1 %v3168_v2  ;;  %3116 = vmatprep.mubr.msk.f32.mxu1 %vm3169_vm0, %v3168_v2 }
  0xa8   :  { %v1808_v61 = vpop.permute.xlu1 %1807  ;;  %v1504_v62 = vpop.permute.xlu0 %1503  ;;  %3115 = vmatpush3.msk.msra.mxu1 %vm50_vm1, %v3277_v6 }
  0xa9   :  { %v1509_v63 = vsel %vm43_vm3, %v1504_v62, %v1506_v59  ;;  %3119 = vmatprep.subr.mxu1 %v3168_v2 }
  0xaa   :  { %2981 = vmatpush1.msk.msra.mxu0 %vm50_vm1, %v1509_v63  ;;  %3117 = vmatmul.mubr.msk.f32.vlgmr.msra.gmra.mxu1 %vm46_vm2, %v3346_v12 }
  0xab   :  { %2982 = vmatmul.mubr.msk.f32.vlgmr.msra.gmra.mxu0 %vm46_vm2, %v3333_v9  ;;  %2985 = vmatprep.subr.msk.mxu0 %vm50_vm1, %v3272_v5 }
  0xac   :  { %v1806_v0 = vpop.permute.xlu1 %1805  ;;  %v1810_v1 = vpop.permute.xlu0 %1809  ;;  %2986 = vmatpush1.msk.msra.mxu0 %vm50_vm1, %v3264_v4  ;;  %1728 = vmatprep.mubr.f32.mxu0 %v3168_v2 }
  0xad   :  { %v1811_v3 = vsel %vm354_vm4, %v1806_v0, %v1808_v61  ;;  %v1812_v6 = vsel %vm354_vm4, %v1808_v61, %v1810_v1  ;;  %3120 = vmatpush3.msk.msra.mxu1 %vm50_vm1, %v1810_v1  ;;  %3121 = vmatprep.mubr.msk.f32.mxu1 %vm3169_vm0, %v3168_v2 }
  0xae   :  { %2990 = vmatprep.subr.msk.mxu0 %vm50_vm1, %v1812_v6  ;;  %3124 = vmatprep.subr.mxu1 %v3168_v2 }
  0xaf   :  { %2987 = vmatmul.mubr.msk.f32.vlgmr.msra.gmra.mxu0 %vm46_vm2, %v3346_v12  ;;  %3122 = vmatmul.mubr.msk.f32.vlgmr.msra.gmra.mxu1 %vm46_vm2, %v3364_v19 }
  0xb0   :  { %2991 = vmatpush1.msk.msra.mxu0 %vm50_vm1, %v1811_v3  ;;  %v1968_v4 = vpop.permute.xlu1 %1967  ;;  %v1966_v5 = vpop.permute.xlu0 %1965  ;;  %1883 = vmatprep.mubr.f32.mxu0 %v3168_v2 }
  0xb1   :  { %v1970_v7 = vsel %vm516_vm5, %v1966_v5, %v1968_v4  ;;  %3125 = vmatpush3.msk.msra.mxu1 %vm50_vm1, %v1968_v4  ;;  %3126 = vmatprep.mubr.msk.f32.mxu1 %vm3169_vm0, %v3168_v2 }
  0xb2   :  { %2995 = vmatprep.subr.msk.mxu0 %vm50_vm1, %v1970_v7  ;;  %3129 = vmatprep.subr.mxu1 %v3168_v2 }
  0xb3   :  { %2992 = vmatmul.mubr.msk.f32.vlgmr.msra.gmra.mxu0 %vm46_vm2, %v3364_v19  ;;  %3127 = vmatmul.mubr.msk.f32.vlgmr.msra.gmra.mxu1 %vm46_vm2, %v3383_v24 }
  0xb4   :  { %v2124_v8 = vpop.permute.xlu1 %2123  ;;  %v1964_v9 = vpop.permute.xlu0 %1963  ;;  %2041 = vmatprep.mubr.f32.mxu0 %v3168_v2  ;;  %3131 = vmatprep.mubr.msk.f32.mxu1 %vm3169_vm0, %v3168_v2 }
  0xb5   :  { %v1969_v10 = vsel %vm516_vm5, %v1964_v9, %v1966_v5 }
  0xb6   :  { %2996 = vmatpush1.msk.msra.mxu0 %vm50_vm1, %v1969_v10 }
  0xb7   :  { %2997 = vmatmul.mubr.msk.f32.vlgmr.msra.gmra.mxu0 %vm46_vm2, %v3383_v24 }
  0xb8   :  { %v2122_v11 = vpop.permute.xlu1 %2121  ;;  %v2126_v12 = vpop.permute.xlu0 %2125  ;;  %2199 = vmatprep.mubr.f32.mxu0 %v3168_v2 }
  0xb9   :  { %v2127_v13 = vsel %vm678_vm6, %v2122_v11, %v2124_v8  ;;  %v2128_v14 = vsel %vm678_vm6, %v2124_v8, %v2126_v12  ;;  %3130 = vmatpush3.msk.msra.mxu1 %vm50_vm1, %v2126_v12 }
  0xba   :  { %3000 = vmatprep.subr.msk.mxu0 %vm50_vm1, %v2128_v14  ;;  %3132 = vmatmul.mubr.msk.f32.vlgmr.msra.gmra.mxu1 %vm46_vm2, %v3405_v31 }
  0xbb   :  { %3001 = vmatpush1.msk.msra.mxu0 %vm50_vm1, %v2127_v13  ;;  %3134 = vmatprep.subr.mxu1 %v3168_v2 }
  0xbc   :  { %v2284_v15 = vpop.permute.xlu1 %2283  ;;  %3002 = vmatmul.mubr.msk.f32.vlgmr.msra.gmra.mxu0 %vm46_vm2, %v3405_v31  ;;  %v2282_v16 = vpop.permute.xlu0 %2281  ;;  %3136 = vmatprep.mubr.msk.f32.mxu1 %vm3169_vm0, %v3168_v2 }
  0xbd   :  { %v2286_v17 = vsel %vm840_vm7, %v2282_v16, %v2284_v15  ;;  %3135 = vmatpush3.msk.msra.mxu1 %vm50_vm1, %v2284_v15  ;;  %2357 = vmatprep.mubr.f32.mxu0 %v3168_v2 }
  0xbe   :  { %3005 = vmatprep.subr.msk.mxu0 %vm50_vm1, %v2286_v17  ;;  %3137 = vmatmul.mubr.msk.f32.vlgmr.msra.gmra.mxu1 %vm46_vm2, %v3423_v36 }
  0xbf   :  { %3139 = vmatprep.subr.mxu1 %v3168_v2  ;;  %3141 = vmatprep.mubr.msk.f32.mxu1 %vm3169_vm0, %v3168_v2 }
  0xc0   :  { %v2440_v18 = vpop.permute.xlu1 %2439  ;;  %v2280_v19 = vpop.permute.xlu0 %2279 }
  0xc1   :  { %v2285_v20 = vsel %vm840_vm7, %v2280_v19, %v2282_v16 }
  0xc2   :  { %3006 = vmatpush1.msk.msra.mxu0 %vm50_vm1, %v2285_v20 }
  0xc3   :  { %3007 = vmatmul.mubr.msk.f32.vlgmr.msra.gmra.mxu0 %vm46_vm2, %v3423_v36 }
  0xc4   :  { %v2438_v21 = vpop.permute.xlu1 %2437  ;;  %v2442_v22 = vpop.permute.xlu0 %2441  ;;  %2515 = vmatprep.mubr.f32.mxu0 %v3168_v2 }
  0xc5   :  { %v2443_v23 = vsel %vm1002_vm8, %v2438_v21, %v2440_v18  ;;  %v2444_v24 = vsel %vm1002_vm8, %v2440_v18, %v2442_v22  ;;  %3140 = vmatpush3.msk.msra.mxu1 %vm50_vm1, %v2442_v22 }
  0xc6   :  { %3010 = vmatprep.subr.msk.mxu0 %vm50_vm1, %v2444_v24  ;;  %3142 = vmatmul.mubr.msk.f32.vlgmr.msra.gmra.mxu1 %vm46_vm2, %v3445_v45 }
  0xc7   :  { %3011 = vmatpush1.msk.msra.mxu0 %vm50_vm1, %v2443_v23  ;;  %3144 = vmatprep.subr.mxu1 %v3168_v2 }
  0xc8   :  { %v2600_v25 = vpop.permute.xlu1 %2599  ;;  %3012 = vmatmul.mubr.msk.f32.vlgmr.msra.gmra.mxu0 %vm46_vm2, %v3445_v45  ;;  %v2598_v26 = vpop.permute.xlu0 %2597  ;;  %3146 = vmatprep.mubr.msk.f32.mxu1 %vm3169_vm0, %v3168_v2 }
  0xc9   :  { %v2602_v27 = vsel %vm1164_vm9, %v2598_v26, %v2600_v25  ;;  %3145 = vmatpush3.msk.msra.mxu1 %vm50_vm1, %v2600_v25  ;;  %2673 = vmatprep.mubr.f32.mxu0 %v3168_v2 }
  0xca   :  { %3015 = vmatprep.subr.msk.mxu0 %vm50_vm1, %v2602_v27  ;;  %3147 = vmatmul.mubr.msk.f32.vlgmr.msra.gmra.mxu1 %vm46_vm2, %v3459_v48 }
  0xcb   :  { %3149 = vmatprep.subr.mxu1 %v3168_v2  ;;  %3151 = vmatprep.mubr.msk.f32.mxu1 %vm3169_vm0, %v3168_v2 }
  0xcc   :  { %v2756_v28 = vpop.permute.xlu1 %2755  ;;  %v2596_v29 = vpop.permute.xlu0 %2595 }
  0xcd   :  { %v2601_v30 = vsel %vm1164_vm9, %v2596_v29, %v2598_v26 }
  0xce   :  { %3016 = vmatpush1.msk.msra.mxu0 %vm50_vm1, %v2601_v30 }
  0xcf   :  { %3017 = vmatmul.mubr.msk.f32.vlgmr.msra.gmra.mxu0 %vm46_vm2, %v3459_v48 }
  0xd0   :  { %v2754_v31 = vpop.permute.xlu1 %2753  ;;  %v2758_v32 = vpop.permute.xlu0 %2757  ;;  %2831 = vmatprep.mubr.f32.mxu0 %v3168_v2 }
  0xd1   :  { %v2759_v33 = vsel %vm1326_vm10, %v2754_v31, %v2756_v28  ;;  %v2760_v34 = vsel %vm1326_vm10, %v2756_v28, %v2758_v32  ;;  %3150 = vmatpush3.msk.msra.mxu1 %vm50_vm1, %v2758_v32 }
  0xd2   :  { %3020 = vmatprep.subr.msk.mxu0 %vm50_vm1, %v2760_v34  ;;  %3152 = vmatmul.mubr.msk.f32.vlgmr.msra.gmra.mxu1 %vm46_vm2, %v3477_v53 }
  0xd3   :  { %3021 = vmatpush1.msk.msra.mxu0 %vm50_vm1, %v2759_v33 }
  0xd4   :  { %3022 = vmatmul.mubr.msk.f32.vlgmr.msra.gmra.mxu0 %vm46_vm2, %v3477_v53 }
  0xdd   :  { %v3607_v22 = vpop.permute.xlu0 %1484 }
 0x136   :  { %v194_v35 = vpop.f32.mrf.mxu1 }
 0x138   :  { %v3068_v36 = vpop.f32.mrf.mxu1 }
 0x13a   :  { %v344_v37 = vpop.f32.mrf.mxu1 }
 0x13b   :  { %v345_v49 = vadd.f32 %v344_v37, %v194_v35 }
 0x13c   :  { %v123_v2 = vpop.f32.mrf.mxu0  ;;  %v3073_v38 = vpop.f32.mrf.mxu1 }
 0x13e   :  { %v125_v39 = vpop.f32.mrf.mxu0 }
 0x13f   :  { %v503_v40 = vpop.f32.mrf.mxu1 }
 0x140   :  { %v273_v41 = vpop.f32.mrf.mxu0  ;;  %v509_v54 = vadd.f32 %v503_v40, %v345_v49 }
 0x141   :  { %v3078_v42 = vpop.f32.mrf.mxu1  ;;  %v274_v53 = vadd.f32 %v273_v41, %v123_v2 }
 0x142   :  { %v275_v43 = vpop.f32.mrf.mxu0 }
 0x143   :  { %v665_v44 = vpop.f32.mrf.mxu1  ;;  %v276_v56 = vadd.f32 %v275_v43, %v125_v39 }
 0x144   :  { %v432_v45 = vpop.f32.mrf.mxu0  ;;  %v671_v60 = vadd.f32 %v665_v44, %v509_v54 }
 0x145   :  { %v3083_v46 = vpop.f32.mrf.mxu1  ;;  %v507_v59 = vadd.f32 %v432_v45, %v274_v53 }
 0x146   :  { %v434_v47 = vpop.f32.mrf.mxu0 }
 0x147   :  { %v508_v62 = vadd.f32 %v434_v47, %v276_v56 }
 0x148   :  { %v594_v48 = vpop.f32.mrf.mxu0 }
 0x149   :  { %v669_v0 = vadd.f32 %v594_v48, %v507_v59 }
 0x14a   :  { %v596_v50 = vpop.f32.mrf.mxu0 }
 0x14b   :  { %v827_v51 = vpop.f32.mrf.mxu1  ;;  %v670_v6 = vadd.f32 %v596_v50, %v508_v62 }
 0x14c   :  { %v756_v52 = vpop.f32.mrf.mxu0  ;;  %v833_v1 = vadd.f32 %v827_v51, %v671_v60 }
 0x14d   :  { %v3088_v55 = vpop.f32.mrf.mxu1  ;;  %v831_v5 = vadd.f32 %v756_v52, %v669_v0 }
 0x14e   :  { %v758_v57 = vpop.f32.mrf.mxu0 }
 0x14f   :  { %v989_v58 = vpop.f32.mrf.mxu1  ;;  %v832_v10 = vadd.f32 %v758_v57, %v670_v6 }
 0x150   :  { %v995_v7 = vadd.f32 %v989_v58, %v833_v1 }
 0x151   :  { %v3093_v61 = vpop.f32.mrf.mxu1 }
 0x153   :  { %v918_v63 = vpop.f32.mrf.mxu0 }
 0x154   :  { %v993_v12 = vadd.f32 %v918_v63, %v831_v5 }
 0x155   :  { %v920_v3 = vpop.f32.mrf.mxu0 }
 0x156   :  { %v994_v16 = vadd.f32 %v920_v3, %v832_v10 }
 0x157   :  { %v1151_v4 = vpop.f32.mrf.mxu1 }
 0x158   :  { %v1080_v8 = vpop.f32.mrf.mxu0  ;;  %v1157_v13 = vadd.f32 %v1151_v4, %v995_v7 }
 0x159   :  { %v3098_v9 = vpop.f32.mrf.mxu1  ;;  %v1155_v18 = vadd.f32 %v1080_v8, %v993_v12 }
 0x15a   :  { %v1082_v14 = vpop.f32.mrf.mxu0 }
 0x15b   :  { %v1313_v11 = vpop.f32.mrf.mxu1  ;;  %v1156_v23 = vadd.f32 %v1082_v14, %v994_v16 }
 0x15c   :  { %v1319_v19 = vadd.f32 %v1313_v11, %v1157_v13 }
 0x15d   :  { %v3103_v15 = vpop.f32.mrf.mxu1 }
 0x15f   :  { %v1242_v17 = vpop.f32.mrf.mxu0 }
 0x160   :  { %v1317_v24 = vadd.f32 %v1242_v17, %v1155_v18 }
 0x161   :  { %v1244_v20 = vpop.f32.mrf.mxu0 }
 0x162   :  { %v1475_v21 = vpop.f32.mrf.mxu1  ;;  %v1318_v28 = vadd.f32 %v1244_v20, %v1156_v23 }
 0x163   :  { %v1481_v25 = vadd.f32 %v1475_v21, %v1319_v19 }
 0x164   :  { %v1404_v26 = vpop.f32.mrf.mxu0  ;;  %v3108_v27 = vpop.f32.mrf.mxu1 }
 0x165   :  { %v1479_v29 = vadd.f32 %v1404_v26, %v1317_v24  ;;  %v1489_v30 = vadd.f32 %v3607_v22, %v1481_v25 }
 0x166   :  { %v1406_v31 = vpop.f32.mrf.mxu0  ;;  %v1654_v32 = vpop.f32.mrf.mxu1 }
 0x167   :  { %v1487_v33 = vadd.f32 %v3607_v22, %v1479_v29  ;;  %v1492_v34 = vmax.f32 %v1489_v30, 0.0  ;;  %v1480_v35 = vadd.f32 %v1406_v31, %v1318_v28 }
 0x168   :  { %v3113_v36 = vpop.f32.mrf.mxu1 }
 0x169   :  { %v1490_v37 = vmax.f32 %v1487_v33, 0.0  ;;  %v1488_v2 = vadd.f32 %v3607_v22, %v1480_v35  ;;  %1496 = vst.msk [vmem:[%s3638_s3 + $0x10] sm:$0xff] %vm1495_vm11, %v1492_v34 }
 0x16a   :  { %v1801_v38 = vpop.f32.mrf.mxu1 }
 0x16b   :  { %1493 = vst [vmem:[%s3638_s3] sm:$0xff] %v1490_v37  ;;  %v1491_v39 = vmax.f32 %v1488_v2, 0.0  ;;  %v1583_v40 = vpop.f32.mrf.mxu0  ;;  %v1802_v55 = vadd.f32 %v1801_v38, %v1654_v32 }
 0x16c   :  { %v3118_v41 = vpop.f32.mrf.mxu1 }
 0x16d   :  { %1494 = vst [vmem:[%s3638_s3 + $0x8] sm:$0xff] %v1491_v39  ;;  %v1585_v42 = vpop.f32.mrf.mxu0 }
 0x16f   :  { %v1730_v43 = vpop.f32.mrf.mxu0  ;;  %v1956_v44 = vpop.f32.mrf.mxu1 }
 0x170   :  { %v1962_v59 = vadd.f32 %v1956_v44, %v1802_v55  ;;  %v1731_v61 = vadd.f32 %v1730_v43, %v1583_v40 }
 0x171   :  { %v1732_v45 = vpop.f32.mrf.mxu0  ;;  %v3123_v46 = vpop.f32.mrf.mxu1 }
 0x172   :  { %v1733_v63 = vadd.f32 %v1732_v45, %v1585_v42 }
 0x173   :  { %v1885_v47 = vpop.f32.mrf.mxu0  ;;  %v2114_v48 = vpop.f32.mrf.mxu1 }
 0x174   :  { %v2120_v0 = vadd.f32 %v2114_v48, %v1962_v59  ;;  %v1960_v6 = vadd.f32 %v1885_v47, %v1731_v61 }
 0x175   :  { %v1887_v49 = vpop.f32.mrf.mxu0  ;;  %v3128_v50 = vpop.f32.mrf.mxu1 }
 0x176   :  { %v1961_v5 = vadd.f32 %v1887_v49, %v1733_v63 }
 0x177   :  { %v2043_v51 = vpop.f32.mrf.mxu0 }
 0x178   :  { %v2118_v10 = vadd.f32 %v2043_v51, %v1960_v6 }
 0x179   :  { %v2045_v52 = vpop.f32.mrf.mxu0 }
 0x17a   :  { %v2272_v53 = vpop.f32.mrf.mxu1  ;;  %v2119_v12 = vadd.f32 %v2045_v52, %v1961_v5 }
 0x17b   :  { %v2278_v7 = vadd.f32 %v2272_v53, %v2120_v0 }
 0x17c   :  { %v3133_v54 = vpop.f32.mrf.mxu1  ;;  %v2201_v56 = vpop.f32.mrf.mxu0 }
 0x17d   :  { %v2276_v13 = vadd.f32 %v2201_v56, %v2118_v10 }
 0x17e   :  { %v2430_v57 = vpop.f32.mrf.mxu1  ;;  %v2203_v60 = vpop.f32.mrf.mxu0 }
 0x17f   :  { %v2436_v14 = vadd.f32 %v2430_v57, %v2278_v7  ;;  %v2277_v16 = vadd.f32 %v2203_v60, %v2119_v12 }
 0x180   :  { %v3138_v58 = vpop.f32.mrf.mxu1 }
 0x183   :  { %v2359_v62 = vpop.f32.mrf.mxu0 }
 0x184   :  { %v2434_v17 = vadd.f32 %v2359_v62, %v2276_v13 }
 0x185   :  { %v2361_v1 = vpop.f32.mrf.mxu0 }
 0x186   :  { %v2588_v3 = vpop.f32.mrf.mxu1  ;;  %v2435_v20 = vadd.f32 %v2361_v1, %v2277_v16 }
 0x187   :  { %v2594_v18 = vadd.f32 %v2588_v3, %v2436_v14 }
 0x188   :  { %v3143_v4 = vpop.f32.mrf.mxu1  ;;  %v2517_v8 = vpop.f32.mrf.mxu0 }
 0x189   :  { %v2592_v21 = vadd.f32 %v2517_v8, %v2434_v17 }
 0x18a   :  { %v2746_v9 = vpop.f32.mrf.mxu1  ;;  %v2519_v15 = vpop.f32.mrf.mxu0 }
 0x18b   :  { %v2752_v23 = vadd.f32 %v2746_v9, %v2594_v18  ;;  %v2593_v26 = vadd.f32 %v2519_v15, %v2435_v20 }
 0x18c   :  { %v3148_v11 = vpop.f32.mrf.mxu1 }
 0x18f   :  { %v2675_v19 = vpop.f32.mrf.mxu0 }
 0x190   :  { %v2750_v27 = vadd.f32 %v2675_v19, %v2592_v21 }
 0x191   :  { %v2677_v24 = vpop.f32.mrf.mxu0 }
 0x192   :  { %v2904_v25 = vpop.f32.mrf.mxu1  ;;  %v2751_v31 = vadd.f32 %v2677_v24, %v2593_v26 }
 0x193   :  { %v2910_v28 = vadd.f32 %v2904_v25, %v2752_v23 }
 0x194   :  { %v2833_v29 = vpop.f32.mrf.mxu0  ;;  %v3153_v30 = vpop.f32.mrf.mxu1 }
 0x195   :  { %v2913_v32 = vadd.f32 %v2910_v28, %v3607_v22  ;;  %v2908_v33 = vadd.f32 %v2833_v29, %v2750_v27 }
 0x196   :  { %v2835_v34 = vpop.f32.mrf.mxu0 }
 0x197   :  { %v2916_v35 = vmax.f32 %v2913_v32, 0.0  ;;  %v2911_v36 = vadd.f32 %v2908_v33, %v3607_v22  ;;  %v2909_v37 = vadd.f32 %v2835_v34, %v2751_v31 }
 0x199   :  { %3027 = vst.msk [vmem:[%s3638_s3 + $0x28] sm:$0xff] %vm1495_vm11, %v2916_v35  ;;  %v2914_v2 = vmax.f32 %v2911_v36, 0.0  ;;  %v2912_v38 = vadd.f32 %v2909_v37, %v3607_v22 }
 0x19b   :  { %3025 = vst [vmem:[%s3638_s3 + $0x18] sm:$0xff] %v2914_v2  ;;  %v2915_v39 = vmax.f32 %v2912_v38, 0.0 }
 0x19d   :  { %3026 = vst [vmem:[%s3638_s3 + $0x20] sm:$0xff] %v2915_v39 }

</bundles_post_ra>
